<compile_context>
chip_gen: v7x
topology: tpu7x:2x2x1
jax: 0.10.0
libtpu: 0.0.40
codegen_flags: <defaults>
</compile_context>

<pallas_src>
import jax
import jax.numpy as jnp
from jax.experimental import pallas as pl
from jax.experimental.pallas import tpu as pltpu


def hw_mixed_kernel(x_ref, w_ref, scale_ref, shift_ref, o_ref):
    """One batch element per grid step.

    x_ref     : (1, H+2, W*Cin)      H-padded, NHWC row-flattened input slab
    w_ref     : (3, W*Cin, W*Cout)   banded conv weights (one band per vertical tap dy)
    scale_ref : (1, W*Cout)          fused per-lane scale  = bn_scale * p      (tiled over W)
    shift_ref : (1, W*Cout)          fused per-lane shift  = (bias*bn_scale + bn_shift) * p
    o_ref     : (1, H, W*Cout)       lane-dense output (W*Cout = 128 here)
    """
    _, hp, _ = x_ref.shape
    h = hp - 2

    acc = jnp.zeros(o_ref.shape[1:], jnp.float32)
    # 3x3 conv == 3 matmuls: sublane-shifted row slab @ banded weight (the dx taps and the
    # SAME-padding along W are folded into the band). Pure ref slices, no relayouts.
    for dy in range(3):
        acc += jnp.dot(x_ref[0, dy:dy + h, :], w_ref[dy],
                       preferred_element_type=jnp.float32)

    # bias + eval-mode BN + (1 - softmax(mix)) * C/(C-1), all folded pre-ReLU.
    # Correct because the folded factor p is strictly positive (softmax entries in (0,1)),
    # so relu(y) * p == relu(y * p).
    acc = acc * scale_ref[...] + shift_ref[...]
    o_ref[0] = jnp.maximum(acc, 0.0)


def _banded_conv_weight(w_hwio, width):
    """Fold the horizontal (dx) taps and SAME padding along W into a banded matrix.

    Returns (3, W*Cin, W*Cout) with
      out[dy, u*Cin + c, x*Cout + co] = w_hwio[dy, u - x + 1, c, co]  if 0 <= u-x+1 <= 2
                                        0                             otherwise.
    The extra zero MACs are free at these shapes: the MXU is latency-bound (M=H=16), and
    the band gives aligned K = W*Cin operands with zero in-kernel data movement.
    (For very large W / channel counts this weight scales as O(W^2) and W should be tiled.)
    """
    _, _, cin, cout = w_hwio.shape
    r = jnp.arange(width * cin)          # = u*Cin + c
    q = jnp.arange(width * cout)         # = x*Cout + co
    u = r // cin
    c = r % cin
    x = q // cout
    co = q % cout
    dx = u[:, None] - x[None, :] + 1                     # (W*Cin, W*Cout)
    valid = (dx >= 0) & (dx <= 2)
    dxc = jnp.clip(dx, 0, 2)
    dy = jnp.arange(3)[:, None, None]
    gathered = w_hwio[dy, dxc[None, :, :], c[None, :, None], co[None, None, :]]
    return jnp.where(valid[None, :, :], gathered, 0.0).astype(jnp.float32)


def hw_mixed_block(x_nchw, w_hwio, bias, gamma, beta, rmean, rvar, mix, norm=True):
    n, cin, h, w = x_nchw.shape
    cout = w_hwio.shape[-1]
    eps = 1e-5

    # --- tiny XLA-side glue (layout change + parameter folding) --------------------------
    # TODO(synk): if the caller can provide NHWC activations directly, the transpose /
    # reshape / 2-row H-pad below (three small XLA ops) disappear entirely.
    x_rows = jnp.transpose(x_nchw, (0, 2, 3, 1)).astype(jnp.float32).reshape(n, h, w * cin)
    x_hpad = jnp.pad(x_rows, ((0, 0), (1, 1), (0, 0)))          # pad only along H

    if norm:
        ns = gamma / jnp.sqrt(rvar + eps)
        nb = beta - rmean * ns
    else:
        ns = jnp.ones((cout,), jnp.float32)
        nb = jnp.zeros((cout,), jnp.float32)

    # p > 0 strictly, so the (1 - softmax) rescale commutes with ReLU and can be folded.
    p = (1.0 - jax.nn.softmax(mix)) * (float(cout) / float(cout - 1))
    scale_c = (ns * p).astype(jnp.float32)                       # (Cout,)
    shift_c = ((bias * ns + nb) * p).astype(jnp.float32)         # (Cout,)
    scale_v = jnp.tile(scale_c, w).reshape(1, w * cout)          # lane q = x*Cout + co
    shift_v = jnp.tile(shift_c, w).reshape(1, w * cout)

    w_band = _banded_conv_weight(w_hwio.astype(jnp.float32), w)  # (3, W*Cin, W*Cout)

    out_rows = pl.pallas_call(
        hw_mixed_kernel,
        out_shape=jax.ShapeDtypeStruct((n, h, w * cout), jnp.float32),
        grid=(n,),
        in_specs=[
            pl.BlockSpec((1, h + 2, w * cin), lambda b: (b, 0, 0)),
            pl.BlockSpec((3, w * cin, w * cout), lambda b: (0, 0, 0)),
            pl.BlockSpec((1, w * cout), lambda b: (0, 0)),
            pl.BlockSpec((1, w * cout), lambda b: (0, 0)),
        ],
        out_specs=pl.BlockSpec((1, h, w * cout), lambda b: (b, 0, 0)),
        compiler_params=pltpu.CompilerParams(dimension_semantics=("parallel",)),
    )(x_hpad, w_band, scale_v, shift_v)

    # (N, H, W*Cout) -> (N, H, W, Cout) -> NCHW
    return jnp.transpose(out_rows.reshape(n, h, w, cout), (0, 3, 1, 2))


def reference(x_nchw, w_hwio, bias, gamma, beta, rmean, rvar, mix, norm=True):
    eps = 1e-5
    cout = w_hwio.shape[-1]
    x = jnp.transpose(x_nchw, (0, 2, 3, 1)).astype(jnp.float32)
    y = jax.lax.conv_general_dilated(
        x, w_hwio.astype(jnp.float32), window_strides=(1, 1), padding="SAME",
        dimension_numbers=("NHWC", "HWIO", "NHWC"))
    y = y + bias
    if norm:
        ns = gamma / jnp.sqrt(rvar + eps)
        y = y * ns + (beta - rmean * ns)
    y = jnp.maximum(y, 0.0)
    p = (1.0 - jax.nn.softmax(mix)) * (float(cout) / float(cout - 1))
    y = y * p
    return jnp.transpose(y, (0, 3, 1, 2))


if __name__ == "__main__":
    # small shapes consistent with the module's forward (W*Cout = 128 -> lane-dense output)
    N, Cin, Cout, H, W = 2, 4, 8, 16, 16
    norm = True

    key = jax.random.PRNGKey(0)
    k_x, k_w, k_b, k_mix = jax.random.split(key, 4)

    x = jax.random.normal(k_x, (N, Cin, H, W), jnp.float32)
    w_hwio = jax.random.normal(k_w, (3, 3, Cin, Cout), jnp.float32) * 0.1
    bias = jax.random.normal(k_b, (Cout,), jnp.float32) * 0.1
    mix = jax.random.normal(k_mix, (Cout,), jnp.float32)
    # BatchNorm2d default (eval-mode) stats / affine params
    gamma = jnp.ones((Cout,), jnp.float32)
    beta = jnp.zeros((Cout,), jnp.float32)
    rmean = jnp.zeros((Cout,), jnp.float32)
    rvar = jnp.ones((Cout,), jnp.float32)

    out = hw_mixed_block(x, w_hwio, bias, gamma, beta, rmean, rvar, mix, norm)
    out = jax.block_until_ready(out)

    ref = reference(x, w_hwio, bias, gamma, beta, rmean, rvar, mix, norm)
    assert out.shape == (N, Cout, H, W)
    assert jnp.allclose(out, ref, atol=1e-4, rtol=1e-4), "mismatch vs reference"

    print("KERNEL_OK")
</pallas_src>

<mosaic_0001>
module attributes {stable_mosaic.version = 11 : i64} {
  func.func @hw_mixed_kernel(%arg0: i32, %arg1: memref<1x18x64xf32, #tpu.memory_space<vmem>>, %arg2: memref<3x64x128xf32, #tpu.memory_space<vmem>>, %arg3: memref<1x128xf32, #tpu.memory_space<vmem>>, %arg4: memref<1x128xf32, #tpu.memory_space<vmem>>, %arg5: memref<1x16x128xf32, #tpu.memory_space<vmem>>) attributes {dimension_semantics = [#tpu.dimension_semantics<parallel>], iteration_bounds = array<i64: 2>, scalar_prefetch = 0 : i64, scratch_operands = 0 : i64, tpu.core_type = #tpu.core_type<tc>, window_params = [{transform_indices = @transform_0, window_bounds = array<i64: 1, 18, 64>}, {pipeline_mode = #tpu.pipeline_mode<synchronous>, transform_indices = @transform_1, window_bounds = array<i64: 3, 64, 128>}, {pipeline_mode = #tpu.pipeline_mode<synchronous>, transform_indices = @transform_2, window_bounds = array<i64: 1, 128>}, {pipeline_mode = #tpu.pipeline_mode<synchronous>, transform_indices = @transform_3, window_bounds = array<i64: 1, 128>}, {transform_indices = @transform_4, window_bounds = array<i64: 1, 16, 128>}]} {
    %cst = arith.constant 0.000000e+00 : f32
    %0 = vector.broadcast %cst : f32 to vector<16x128xf32>
    %c0 = arith.constant 0 : index
    %c0_0 = arith.constant 0 : index
    %c0_1 = arith.constant 0 : index
    %1 = vector.load %arg1[%c0, %c0_0, %c0_1] : memref<1x18x64xf32, #tpu.memory_space<vmem>>, vector<1x16x64xf32>
    %2 = vector.shape_cast %1 : vector<1x16x64xf32> to vector<16x64xf32>
    %c0_2 = arith.constant 0 : index
    %c0_3 = arith.constant 0 : index
    %c0_4 = arith.constant 0 : index
    %3 = vector.load %arg2[%c0_2, %c0_3, %c0_4] : memref<3x64x128xf32, #tpu.memory_space<vmem>>, vector<1x64x128xf32>
    %4 = vector.shape_cast %3 : vector<1x64x128xf32> to vector<64x128xf32>
    %cst_5 = arith.constant dense<0.000000e+00> : vector<16x128xf32>
    %5 = tpu.matmul %2, %4, %cst_5 {dimension_numbers = #tpu.dot_dimension_numbers<[1], [0], [0], [1], [0, 0, 1, 1], [], []>} : vector<16x64xf32>, vector<64x128xf32>, vector<16x128xf32> -> vector<16x128xf32>
    %6 = arith.addf %0, %5 : vector<16x128xf32>
    %c0_6 = arith.constant 0 : index
    %c1 = arith.constant 1 : index
    %c0_7 = arith.constant 0 : index
    %7 = vector.load %arg1[%c0_6, %c1, %c0_7] : memref<1x18x64xf32, #tpu.memory_space<vmem>>, vector<1x16x64xf32>
    %8 = vector.shape_cast %7 : vector<1x16x64xf32> to vector<16x64xf32>
    %c1_8 = arith.constant 1 : index
    %c0_9 = arith.constant 0 : index
    %c0_10 = arith.constant 0 : index
    %9 = vector.load %arg2[%c1_8, %c0_9, %c0_10] : memref<3x64x128xf32, #tpu.memory_space<vmem>>, vector<1x64x128xf32>
    %10 = vector.shape_cast %9 : vector<1x64x128xf32> to vector<64x128xf32>
    %cst_11 = arith.constant dense<0.000000e+00> : vector<16x128xf32>
    %11 = tpu.matmul %8, %10, %cst_11 {dimension_numbers = #tpu.dot_dimension_numbers<[1], [0], [0], [1], [0, 0, 1, 1], [], []>} : vector<16x64xf32>, vector<64x128xf32>, vector<16x128xf32> -> vector<16x128xf32>
    %12 = arith.addf %6, %11 : vector<16x128xf32>
    %c0_12 = arith.constant 0 : index
    %c2 = arith.constant 2 : index
    %c0_13 = arith.constant 0 : index
    %13 = vector.load %arg1[%c0_12, %c2, %c0_13] : memref<1x18x64xf32, #tpu.memory_space<vmem>>, vector<1x16x64xf32>
    %14 = vector.shape_cast %13 : vector<1x16x64xf32> to vector<16x64xf32>
    %c2_14 = arith.constant 2 : index
    %c0_15 = arith.constant 0 : index
    %c0_16 = arith.constant 0 : index
    %15 = vector.load %arg2[%c2_14, %c0_15, %c0_16] : memref<3x64x128xf32, #tpu.memory_space<vmem>>, vector<1x64x128xf32>
    %16 = vector.shape_cast %15 : vector<1x64x128xf32> to vector<64x128xf32>
    %cst_17 = arith.constant dense<0.000000e+00> : vector<16x128xf32>
    %17 = tpu.matmul %14, %16, %cst_17 {dimension_numbers = #tpu.dot_dimension_numbers<[1], [0], [0], [1], [0, 0, 1, 1], [], []>} : vector<16x64xf32>, vector<64x128xf32>, vector<16x128xf32> -> vector<16x128xf32>
    %18 = arith.addf %12, %17 : vector<16x128xf32>
    %c0_18 = arith.constant 0 : index
    %c0_19 = arith.constant 0 : index
    %19 = vector.load %arg3[%c0_18, %c0_19] : memref<1x128xf32, #tpu.memory_space<vmem>>, vector<1x128xf32>
    %20 = vector.broadcast %19 : vector<1x128xf32> to vector<16x128xf32>
    %21 = arith.mulf %18, %20 : vector<16x128xf32>
    %c0_20 = arith.constant 0 : index
    %c0_21 = arith.constant 0 : index
    %22 = vector.load %arg4[%c0_20, %c0_21] : memref<1x128xf32, #tpu.memory_space<vmem>>, vector<1x128xf32>
    %23 = vector.broadcast %22 : vector<1x128xf32> to vector<16x128xf32>
    %24 = arith.addf %21, %23 : vector<16x128xf32>
    %cst_22 = arith.constant 0.000000e+00 : f32
    %25 = vector.broadcast %cst_22 : f32 to vector<16x128xf32>
    %26 = arith.maximumf %24, %25 : vector<16x128xf32>
    %c0_23 = arith.constant 0 : index
    %c0_24 = arith.constant 0 : index
    %c0_25 = arith.constant 0 : index
    %27 = vector.load %arg5[%c0_23, %c0_24, %c0_25] : memref<1x16x128xf32, #tpu.memory_space<vmem>>, vector<1x16x128xf32>
    %28 = vector.shape_cast %27 : vector<1x16x128xf32> to vector<16x128xf32>
    %29 = vector.shape_cast %26 : vector<16x128xf32> to vector<1x16x128xf32>
    tpu.vector_store %arg5[%c0_23, %c0_24, %c0_25], %29 {strides = array<i32>} : memref<1x16x128xf32, #tpu.memory_space<vmem>>, vector<1x16x128xf32>,
    return
  }
  func.func @transform_0(%arg0: i32) -> (i32, i32, i32) {
    %c0_i32 = arith.constant 0 : i32
    %c0_i32_0 = arith.constant 0 : i32
    %c0_i32_1 = arith.constant 0 : i32
    return %arg0, %c0_i32, %c0_i32_0 : i32, i32, i32
  }
  func.func @transform_1(%arg0: i32) -> (i32, i32, i32) {
    %c0_i32 = arith.constant 0 : i32
    %c0_i32_0 = arith.constant 0 : i32
    %c0_i32_1 = arith.constant 0 : i32
    %c0_i32_2 = arith.constant 0 : i32
    return %c0_i32, %c0_i32_0, %c0_i32_1 : i32, i32, i32
  }
  func.func @transform_2(%arg0: i32) -> (i32, i32) {
    %c0_i32 = arith.constant 0 : i32
    %c0_i32_0 = arith.constant 0 : i32
    %c0_i32_1 = arith.constant 0 : i32
    return %c0_i32, %c0_i32_0 : i32, i32
  }
  func.func @transform_3(%arg0: i32) -> (i32, i32) {
    %c0_i32 = arith.constant 0 : i32
    %c0_i32_0 = arith.constant 0 : i32
    %c0_i32_1 = arith.constant 0 : i32
    return %c0_i32, %c0_i32_0 : i32, i32
  }
  func.func @transform_4(%arg0: i32) -> (i32, i32, i32) {
    %c0_i32 = arith.constant 0 : i32
    %c0_i32_0 = arith.constant 0 : i32
    %c0_i32_1 = arith.constant 0 : i32
    return %arg0, %c0_i32, %c0_i32_0 : i32, i32, i32
  }
}

</mosaic_0001>

<bundles_post_ra>
// kernel: tpu_custom_call.1
= control target key start
LH: loop header
LB: loop body
LE: loop exit
PB: predicated region body
PF: predicated region fallthrough
CT: control target
= control target key end

     0   :  { %9 = vsyncpa [#allocation3], 0  ;;  %s1100_s0 = inlined_call_operand.vmem [shape: f32[2,18,64], index: 0, kind: input, shape index: {}]   ;;  %s1101_s1 = inlined_call_operand.hbm [shape: f32[3,64,128], index: 1, kind: input, shape index: {}]   ;;  %s1102_s2 = inlined_call_operand.vmem [shape: f32[1,128], index: 2, kind: input, shape index: {}]   ;;  %s1103_s3 = inlined_call_operand.vmem [shape: f32[1,128], index: 3, kind: input, shape index: {}]   ;;  %s1104_s4 = inlined_call_operand.hbm [shape: f32[2,16,128], index: 4, kind: output, shape index: {}]  }
   0x1   :  { %10 = vsyncpa [#allocation4], 0 }
   0x2   :  { %12 = vsyncpa [#allocation4 + $0x1], 0  ;;  %s942_s15 = smov 0   ;;  %s944_s16 = smov 0  }
   0x3   :  { %s946_s17 = smov 0   ;;  %s948_s18 = smov 0  }
   0x4 LB: > { %s963_s19 = sadd.s32 4294967295, %s909_s18   ;;  %s599_s20 = sadd.s32 4294967294, %s909_s18   ;;  %s909_s18 = sphi %s948_s18, %s1120_s18   ;;  %s905_s17 = sphi %s946_s17, %s1119_s17   ;;  %s901_s16 = sphi %s944_s16, %s1118_s16   ;;  %s897_s15 = sphi %s942_s15, %s1117_s15  }
   0x5   : > { %s967_s21 = sadd.s32 1, %s909_s18   ;;  %s114_s22 = sadd.s32 1, %s905_s17 }
   0x6   : > { %s111_s23 = ssub.s32 %s909_s18, %s967_s21  ;;  %p124_p0 = scmp.ne.s32.totalorder %s905_s17, %s901_s16 }
   0x7   : > { %p112_p1 = scmp.eq.s32.totalorder %s111_s23, 0  ;;  %p125_p2 = scmp.eq.s32.totalorder %s963_s19, 1 }
   0x8   : > { %p130_p3 = scmp.ne.s32.totalorder %s901_s16, %s897_s15  ;;  %p131_p4 = scmp.eq.s32.totalorder %s599_s20, 1 }
   0x9   : > { %s978_s24 = scalar_select %p112_p1, %s905_s17, %s114_s22  }
   0xa   : > { %p980_p5 = por %p125_p2, %p124_p0  ;;  %p984_p6 = por %p131_p4, %p130_p3 }
   0xb   : > { %p600_p7 = scmp.ge.s32.totalorder %s909_s18, 1  ;;  %p138_p8 = scmp.lt.s32.totalorder %s909_s18, 3 }
   0xc   : > { %s1108_s25 = scalar_select %p980_p5, 1, 0 }
   0xd   : > { %s1109_s26 = scalar_select %p984_p6, 1, 0 }
   0xe   : > { %p1105_p9 = scmp.eq.s32.totalorder %s963_s19, 0  ;;  %p991_p10 = pnand %p600_p7, %p138_p8 }
   0xf   : > { %s911_s28 = smov [#allocation2]   ;;  %s815_s7 = scalar_lea.hbm %s1101_s1, 3072 }
  0x10   : > { %s1110_s27 = scalar_select %p991_p10, 1, 0 }
  0x11   : > { %s150_s29 = sshll.u32 %s911_s28, 4  ;;  %p767_p11 = pneg %p991_p10  ;;  %s151_s29 = int_to_ptr.vmem [resolvable:$true] %s150_s29 }
  0x12   : > { %p816_p13 = scmp.ne.s32.totalorder %s1101_s1, %s815_s7  ;;  %p822_p3 = scmp.lt.u32.totalorder %s815_s7, %s1101_s1 }
  0x13   : > { %p999_p12 = pnand %p1105_p9, %p767_p11 }
  0x15   : > { %p817_p0 = pneg %p999_p12 }
  0x17   : > { %p818_p1 = pnand %p817_p0, %p816_p13 }
  0x19   : > { %p819_p2 = pneg %p818_p1 }
  0x1b   : > { %p824_p4 = pnand %p822_p3, %p819_p2 }
  0x1d   : > { %827 = shalt.err (!%p824_p4)
}
  0x1e   : > { %s828_s12 = scalar_lea.vmem %s151_s29, 3072  ;;  %p836_p9 = scmp.lt.s32.totalorder %s151_s29, %s151_s29 }
  0x1f   : > { %p829_p7 = scmp.ne.s32.totalorder %s151_s29, %s828_s12  ;;  %p837_p6 = scmp.lt.s32.totalorder %s828_s12, %s828_s12 }
  0x21   : > { %p831_p8 = pnand %p829_p7, %p817_p0  ;;  %p838_p5 = por %p837_p6, %p836_p9 }
  0x23   : > { %p832_p11 = pneg %p831_p8 }
  0x25   : > { %p839_p10 = pnand %p838_p5, %p832_p11 }
  0x27   : > { %842 = shalt.err (!%p839_p10)
}
  0x28   : > { %s912_s13 = smov 128   ;;  %s913_s14 = smov 8  }
  0x29   : > { %770 = dma.hbm_to_vmem [thread:$0]  (!%p999_p12), %s1101_s1, 3072, %s151_s29, [#allocation3], %s912_s13, %s912_s13, %s913_s14  }
  0x2a   : > { %p1112_p13 = scmp.ne.s32.totalorder %s1110_s27, 0 }
  0x2b   : > { %p1113_p1 = scmp.eq.s32.totalorder (!%p1112_p13), %s963_s19, 0 }
  0x2c   : > { %180 = sbr.rel (%p1112_p13) target bundleno = 323 (0x143), region = 36 }
  0x33   : > { %888 = dma.done.wait (%p1113_p1), [#allocation3], 3072   ;;  %p1114_p0 = pmov %p1113_p1 }
  0x34   : > { %p206_p5 = scmp.lt.s32.totalorder %s963_s19, 1  ;;  %v213_v0 = vld [vmem:[#allocation2] sm:$0xff]  ;;  %v214_v1 = vld [vmem:[#allocation2 + $0x8] sm:$0xff]  ;;  %v215_v2 = vld [vmem:[#allocation2 + $0x10] sm:$0xff]  ;;  %vm232_vm0 = vcmask 523264   ;;  %s203_s27 = sand.u32 1, %s901_s16  }
  0x35   : > { %890 = vsyncadd (%p1114_p0), [#allocation3], 4294964224  ;;  %v724_v3 = vpack.c.bf16 %v214_v1, %v213_v0  ;;  %v216_v4 = vld [vmem:[#allocation2 + $0x18] sm:$0xff]  ;;  %v217_v6 = vld [vmem:[#allocation2 + $0x20] sm:$0xff]  ;;  %s605_s6 = sshll.u32 %s203_s27, 4  ;;  %s620_s13 = sshll.u32 %s963_s19, 8 }
  0x36   : > { %s207_s23 = scalar_select %p206_p5, %s963_s19, 1  ;;  %v728_v5 = vpack.c.bf16 %v216_v4, %v215_v2  ;;  %v218_v7 = vld [vmem:[#allocation2 + $0x28] sm:$0xff]  ;;  %v224_v8 = vld [vmem:[#allocation2 + $0x40] sm:$0xff]  ;;  %v226_v12 = vld [vmem:[#allocation2 + $0x50] sm:$0xff] }
  0x37   : > { %725 = vmatprep.subr.bf16.mxu0 %v724_v3  ;;  %v225_v9 = vld [vmem:[#allocation2 + $0x48] sm:$0xff]  ;;  %v732_v13 = vpack.c.bf16 %v218_v7, %v217_v6  ;;  %v219_v14 = vld [vmem:[#allocation2 + $0x30] sm:$0xff]  ;;  %v227_v15 = vld [vmem:[#allocation2 + $0x58] sm:$0xff]  ;;  %s205_s11 = scalar_lea.vmem [#allocation5], %s605_s6  ;;  %s1057_s22 = scalar_lea.hbm %s1104_s4, %s620_s13 }
  0x38   : > { %s760_s28 = smul.u32 24, %s207_s23  ;;  %727 = vmatpush3.bf16.msra.mxu0 %v724_v3  ;;  %v708_v11 = vpack.c.bf16 %v225_v9, %v224_v8  ;;  %v220_v16 = vld [vmem:[#allocation2 + $0x38] sm:$0xff]  ;;  %v712_v17 = vpack.c.bf16 %v227_v15, %v226_v12  ;;  %v228_v18 = vld [vmem:[#allocation2 + $0x60] sm:$0xff]  ;;  %v229_v19 = vld [vmem:[#allocation2 + $0x68] sm:$0xff]  ;;  %s525_s12 = sshll.u32 %s205_s11, 4  ;;  %s1052_s12 = int_to_ptr.vmem [resolvable:$true] %s525_s12 }
  0x39   : > { %729 = vmatprep.subr.bf16.mxu0 %v728_v5  ;;  %v716_v20 = vpack.c.bf16 %v229_v19, %v228_v18  ;;  %v736_v22 = vpack.c.bf16 %v220_v16, %v219_v14  ;;  %v230_v23 = vld [vmem:[#allocation2 + $0x70] sm:$0xff]  ;;  %v231_v24 = vld [vmem:[#allocation2 + $0x78] sm:$0xff]  ;;  %v398_v25 = vld [vmem:[#allocation2 + $0x80] sm:$0xff]  ;;  %s1059_s23 = scalar_lea.sflag [#allocation4], %s203_s27  ;;  %p1115_p9 = scmp.ne.s32.totalorder %s1108_s25, 0 }
  0x3a   : > { %s1030_s29 = scalar_lea.vmem %s1100_s0, %s760_s28  ;;  %709 = vmatprep.subr.bf16.mxu1 %v708_v11  ;;  %v399_v26 = vld [vmem:[#allocation2 + $0x88] sm:$0xff]  ;;  %v720_v27 = vpack.c.bf16 %v231_v24, %v230_v23  ;;  %v400_v29 = vld [vmem:[#allocation2 + $0x90] sm:$0xff]  ;;  %v401_v30 = vld [vmem:[#allocation2 + $0x98] sm:$0xff]  ;;  %s843_s28 = scalar_lea.vmem %s1052_s12, 256 }
  0x3b   : > { %v211_v10 = vld [vmem:[%s1030_s29] sm:$0xff]  ;;  %711 = vmatpush3.bf16.msra.mxu1 %v708_v11  ;;  %v740_v28 = vpack.c.bf16 %v399_v26, %v398_v25  ;;  %v212_v31 = vld [vmem:[%s1030_s29 + $0x8] sm:$0xff]  ;;  %v744_v32 = vpack.c.bf16 %v401_v30, %v400_v29  ;;  %v402_v34 = vld [vmem:[#allocation2 + $0xa0] sm:$0xff]  ;;  %p844_p6 = scmp.ne.s32.totalorder %s1052_s12, %s843_s28  ;;  %s914_s19 = smov [#allocation5]  }
  0x3c   : > { %686 = vmatprep.mubr.msk.f32.mxu0 %vm232_vm0, %v211_v10  ;;  %731 = vmatpush3.bf16.msra.mxu0 %v728_v5  ;;  %v221_v21 = vld [vmem:[%s1030_s29 + $0x1] sm:$0xff]  ;;  %v403_v35 = vld [vmem:[#allocation2 + $0xa8] sm:$0xff]  ;;  %v222_v36 = vld [vmem:[%s1030_s29 + $0x9] sm:$0xff]  ;;  %s847_s30 = sshll.u32 %s914_s19, 4  ;;  %s848_s30 = int_to_ptr.vmem [resolvable:$false] %s847_s30 }
  0x3d   : > { %713 = vmatprep.subr.bf16.mxu1 %v712_v17  ;;  %733 = vmatprep.subr.bf16.mxu0 %v732_v13  ;;  %v395_v33 = vld [vmem:[%s1030_s29 + $0x2] sm:$0xff]  ;;  %v748_v37 = vpack.c.bf16 %v403_v35, %v402_v34  ;;  %v396_v41 = vld [vmem:[%s1030_s29 + $0xa] sm:$0xff]  ;;  %v613_v45 = vld [vmem:[%s1102_s2] ss:$0 sm:$0xff]  ;;  %p845_p10 = pnand %p844_p6, %p1115_p9  ;;  %s849_s5 = scalar_lea.vmem %s848_s30, 512 }
  0x3e   : > { %667 = vmatprep.mubr.msk.f32.mxu1 %vm232_vm0, %v221_v21  ;;  %v404_v38 = vld [vmem:[#allocation2 + $0xb0] sm:$0xff]  ;;  %v405_v39 = vld [vmem:[#allocation2 + $0xb8] sm:$0xff]  ;;  %p850_p2 = scmp.lt.s32.totalorder %s1052_s12, %s848_s30  ;;  %p851_p3 = scmp.lt.s32.totalorder %s849_s5, %s843_s28 }
  0x3f   : > { %715 = vmatpush3.bf16.msra.mxu1 %v712_v17  ;;  %v752_v40 = vpack.c.bf16 %v405_v39, %v404_v38  ;;  %v614_v48 = vld [vmem:[%s1103_s3] ss:$0 sm:$0xff]  ;;  %p846_p12 = pneg %p845_p10 }
  0x40   : > { %735 = vmatpush3.bf16.msra.mxu0 %v732_v13  ;;  %717 = vmatprep.subr.bf16.mxu1 %v716_v20  ;;  %p852_p4 = por %p851_p3, %p850_p2 }
  0x41   : > { %737 = vmatprep.subr.bf16.mxu0 %v736_v22 }
  0x42   : > { %p853_p7 = pnand %p852_p4, %p846_p12 }
  0x43   : > { %719 = vmatpush3.bf16.msra.mxu1 %v716_v20 }
  0x44   : > { %739 = vmatpush3.bf16.msra.mxu0 %v736_v22  ;;  %721 = vmatprep.subr.bf16.mxu1 %v720_v27 }
  0x45   : > { %741 = vmatprep.subr.bf16.mxu0 %v740_v28 }
  0x47   : > { %687 = vmatmul.mubr.msk.f32.vlgmr.msra.gmra.mrb[0].mxu0 %vm232_vm0, %v212_v31  ;;  %723 = vmatpush3.bf16.msra.mxu1 %v720_v27 }
  0x48   : > { %743 = vmatpush3.bf16.msra.mxu0 %v740_v28  ;;  %705 = vmatprep.mubr.msk.f32.mxu0 %vm232_vm0, %v395_v33 }
  0x49   : > { %745 = vmatprep.subr.bf16.mxu0 %v744_v32 }
  0x4a   : > { %668 = vmatmul.mubr.msk.f32.vlgmr.msra.gmra.mrb[0].mxu1 %vm232_vm0, %v222_v36 }
  0x4c   : > { %747 = vmatpush3.bf16.msra.mxu0 %v744_v32 }
  0x4d   : > { %749 = vmatprep.subr.bf16.mxu0 %v748_v37 }
  0x50   : > { %751 = vmatpush3.bf16.msra.mxu0 %v748_v37 }
  0x51   : > { %753 = vmatprep.subr.bf16.mxu0 %v752_v40 }
  0x54   : > { %755 = vmatpush3.bf16.msra.mxu0 %v752_v40 }
  0x57   : > { %706 = vmatmul.mubr.msk.f32.vlgmr.msra.gmra.mrb[0].mxu0 %vm232_vm0, %v396_v41 }
 0x11d   : > { %v669_v42 = vpop.f32.mrb[0].mxu1 }
 0x11e   : > { %v305_v43 = vpop.f32.mrb[1].mxu1 }
 0x12a   : > { %v707_v44 = vpop.f32.mrb[0].mxu0 }
 0x12b   : > { %v756_v46 = vadd.f32 %v707_v44, %v669_v42  ;;  %v478_v47 = vpop.f32.mrb[1].mxu0 }
 0x12c   : > { %v757_v49 = vadd.f32 %v478_v47, %v305_v43 }
 0x12d   : > { %v497_v50 = vmul.f32 %v756_v46, %v613_v45 }
 0x12e   : > { %v496_v51 = vmul.f32 %v757_v49, %v613_v45 }
 0x12f   : > { %v506_v52 = vadd.f32 %v614_v48, %v497_v50 }
 0x130   : > { %v505_v53 = vadd.f32 %v614_v48, %v496_v51 }
 0x131   : > { %v508_v54 = vmax.f32 %v506_v52, 0.0 }
 0x132   : > { %v507_v55 = vmax.f32 %v505_v53, 0.0 }
 0x133   : > { %510 = vst [vmem:[%s205_s11 + $0x8] sm:$0xff] %v508_v54 }
 0x134   : > { %509 = vst [vmem:[%s205_s11] sm:$0xff] %v507_v55 }
 0x135   : > { %856 = shalt.err (!%p853_p7)
}
 0x136   : > { %s857_s29 = scalar_lea.hbm %s1057_s22, 256  ;;  %s861_s7 = scalar_lea.hbm %s1104_s4, 512 }
 0x137   : > { %p858_p8 = scmp.ne.s32.totalorder %s1057_s22, %s857_s29  ;;  %p862_p1 = scmp.lt.u32.totalorder %s1057_s22, %s1104_s4 }
 0x138   : > { %p863_p0 = scmp.lt.u32.totalorder %s861_s7, %s857_s29  ;;  %p865_p6 = scmp.lt.u32.totalorder %s857_s29, %s1057_s22 }
 0x139   : > { %p859_p11 = pnand %p858_p8, %p1115_p9 }
 0x13a   : > { %p864_p5 = por %p863_p0, %p862_p1 }
 0x13b   : > { %p860_p13 = pneg %p859_p11 }
 0x13c   : > { %p866_p10 = por %p865_p6, %p864_p5 }
 0x13e   : > { %p867_p12 = pnand %p866_p10, %p860_p13 }
 0x140   : > { %870 = shalt.err (!%p867_p12)
}
 0x141   : > { %s915_s10 = smov 128   ;;  %s916_s11 = smov 8  }
 0x142   : > { %765 = dma.vmem_to_hbm [thread:$0]  (%p1115_p9), %s1052_s12, 256, %s1057_s22, %s1059_s23, %s915_s10, %s915_s10, %s916_s11  }
 0x143 PF: > { %p777_p2 = scmp.ge.s32.totalorder %s909_s18, 2  ;;  %s540_s13 = sand.u32 1, %s897_s15  }
 0x144   : > { %p1116_p3 = scmp.ne.s32.totalorder %s1109_s26, 0  ;;  %s541_s14 = scalar_lea.sflag [#allocation4], %s540_s13 }
 0x146   : > { %p772_p4 = pnand %p777_p2, %p1116_p3 }
 0x148   : > { %892 = dma.done.wait (!%p772_p4), %s541_s14, 256  }
 0x149   : > { %894 = vsyncadd (!%p772_p4), %s541_s14, 4294967040  ;;  %p15_p7 = scmp.ge.s32.totalorder %s967_s21, 4   ;;  %s1117_s15 = smov %s901_s16 }
 0x14a   : > { %s1118_s16 = smov %s905_s17  ;;  %s1119_s17 = smov %s978_s24 }
 0x14b   : > { %s1120_s18 = smov %s967_s21  ;;  %17 = sbr.rel (!%p15_p7) target bundleno = 4 (0x4), region = 78 }
 0x152   :  { %546 = vsyncpa [#allocation3], 1 }
 0x153   :  { %548 = vsyncpa [#allocation3 + $0x1], 1 }
 0x154   :  { %549 = vsyncpa [#allocation4], 1 }
 0x155   :  { %551 = vsyncpa [#allocation4 + $0x1], 1 }

</bundles_post_ra>
